<compile_context>
chip_gen: v6e
topology: v6e:2x2x1
jax: 0.10.0
libtpu: 0.0.40
codegen_flags: <defaults>
</compile_context>

<pallas_src>
import functools

import jax
import jax.numpy as jnp
from jax.experimental import pallas as pl
from jax.experimental.pallas import tpu as pltpu

N_IN = 3 * 32 * 32   # 3072, fixed by the module's x.view(-1, 3*32*32)
LANE = 128


def _round_up(x, m):
    return ((x + m - 1) // m) * m


def _mlp_kernel(x_ref, w1_ref, b1_ref, w2_ref, b2_ref, w3_ref, b3_ref, o_ref):
    """Fused 3-layer MLP forward on one batch tile.

    x tile:    (TB, 3072) f32 or bf16 (cast to bf16 for the MXU if needed)
    weights:   (in, out)  bf16, resident across the whole grid (constant index_map)
    biases:    (1, out)   f32
    output:    (TB, 128)  f32 (lane-padded classes; wrapper slices to n_classes)
    """
    x = x_ref[...].astype(jnp.bfloat16)                                   # no-op if already bf16
    h = jnp.dot(x, w1_ref[...], preferred_element_type=jnp.float32)       # MXU, f32 acc
    h = jnp.maximum(h + b1_ref[...], 0.0)                                 # f32 bias+ReLU (VPU)
    h = jnp.dot(h.astype(jnp.bfloat16), w2_ref[...],
                preferred_element_type=jnp.float32)
    h = jnp.maximum(h + b2_ref[...], 0.0)
    o = jnp.dot(h.astype(jnp.bfloat16), w3_ref[...],
                preferred_element_type=jnp.float32)
    o_ref[...] = (o + b3_ref[...]).astype(o_ref.dtype)


def prepare_params(params):
    """One-time conversion of PyTorch-layout params to kernel-ready arrays.

    - weights (out, in) -> (in, out), cast to bf16 (halves weight HBM traffic)
    - biases reshaped to (1, out), kept f32
    - final layer padded to a multiple of 128 output lanes (zero columns) so the
      kernel writes lane-dense output blocks
    Returns (kernel_params_dict, n_classes).
    """
    w1 = params["w1"].T.astype(jnp.bfloat16)
    w2 = params["w2"].T.astype(jnp.bfloat16)
    w3 = params["w3"].T.astype(jnp.bfloat16)
    b1 = params["b1"].reshape(1, -1).astype(jnp.float32)
    b2 = params["b2"].reshape(1, -1).astype(jnp.float32)
    b3 = params["b3"].reshape(1, -1).astype(jnp.float32)

    n_classes = w3.shape[1]
    c_pad = _round_up(n_classes, LANE)
    w3p = jnp.zeros((w3.shape[0], c_pad), jnp.bfloat16).at[:, :n_classes].set(w3)
    b3p = jnp.zeros((1, c_pad), jnp.float32).at[:, :n_classes].set(b3)

    kp = dict(w1=w1, b1=b1, w2=w2, b2=b2, w3=w3p, b3=b3p)
    return kp, n_classes


@functools.partial(jax.jit, static_argnames=("n_classes", "tb"))
def mlp_forward(x_nchw, kp, n_classes, tb=1024):
    """x_nchw: (B, 3, 32, 32), f32 or bf16. kp: output of prepare_params."""
    B = x_nchw.shape[0]
    # Same semantics as torch .view(-1, 3*32*32); dtype is passed through as-is
    # (feed bf16 from the data pipeline to halve the dominant HBM read).
    x2d = x_nchw.reshape(B, N_IN)
    x_bytes = x2d.dtype.itemsize

    # Sublane alignment: bf16 tiles want (16,128) min, f32 tiles (8,128).
    sub = 16 if x2d.dtype == jnp.bfloat16 else 8

    # Batch tile. For small batches, split into >=2 grid steps when possible so
    # dimension_semantics=("parallel",) engages both TensorCores on v7x.
    if B <= tb:
        tb_eff = max(sub, _round_up(pl.cdiv(B, 2), sub))
    else:
        tb_eff = _round_up(tb, sub)
    grid = (pl.cdiv(B, tb_eff),)   # partial final block is masked by Pallas; no jnp.pad

    w1, b1 = kp["w1"], kp["b1"]
    w2, b2 = kp["w2"], kp["b2"]
    w3, b3 = kp["w3"], kp["b3"]
    h0, h1, c_pad = w1.shape[1], w2.shape[1], w3.shape[1]

    # Weights/biases: full-array blocks with constant index_map -> fetched once,
    # resident in VMEM across all batch tiles.
    def const_spec(a):
        return pl.BlockSpec(a.shape, lambda i, _nd=a.ndim: (0,) * _nd)

    flops = 2 * B * (N_IN * h0 + h0 * h1 + h1 * c_pad)
    bytes_accessed = (x2d.size * x_bytes                   # activations in
                      + (w1.size + w2.size + w3.size) * 2  # bf16 weights
                      + (b1.size + b2.size + b3.size) * 4  # f32 biases
                      + B * c_pad * 4)                     # output
    cost = pl.CostEstimate(flops=flops, transcendentals=0,
                           bytes_accessed=bytes_accessed)

    # VMEM budget: double-buffered x/out tiles + (double-buffered) weights + slack,
    # clamped to <= 48 MiB so it stays well inside v7x's 64 MiB physical VMEM.
    weight_bytes = ((w1.size + w2.size + w3.size) * 2
                    + (b1.size + b2.size + b3.size) * 4)
    vmem_needed = 2 * (tb_eff * N_IN * x_bytes + tb_eff * c_pad * 4 + weight_bytes)
    vmem_limit = int(min(max(vmem_needed + (4 << 20), 32 << 20), 48 << 20))

    out = pl.pallas_call(
        _mlp_kernel,
        out_shape=jax.ShapeDtypeStruct((B, c_pad), jnp.float32),
        grid=grid,
        in_specs=[
            pl.BlockSpec((tb_eff, N_IN), lambda i: (i, 0)),   # batch-tiled x
            const_spec(w1), const_spec(b1),
            const_spec(w2), const_spec(b2),
            const_spec(w3), const_spec(b3),
        ],
        out_specs=pl.BlockSpec((tb_eff, c_pad), lambda i: (i, 0)),
        compiler_params=pltpu.CompilerParams(
            dimension_semantics=("parallel",),     # megacore sharding on v7x
            vmem_limit_bytes=vmem_limit,
        ),
        cost_estimate=cost,
    )(x2d, w1, b1, w2, b2, w3, b3)

    return out[:, :n_classes]


def init_params(key, n_inputs, n_hidden, n_classes):
    """Deterministic PyTorch-style init: U(-1/sqrt(fan_in), 1/sqrt(fan_in)); (out, in) layout."""
    dims = [n_inputs] + list(n_hidden) + [n_classes]
    params = {}
    keys = jax.random.split(key, 2 * (len(dims) - 1))
    for i in range(len(dims) - 1):
        fan_in, fan_out = dims[i], dims[i + 1]
        bound = 1.0 / (fan_in ** 0.5)
        params[f"w{i+1}"] = jax.random.uniform(
            keys[2 * i], (fan_out, fan_in), jnp.float32, -bound, bound)
        params[f"b{i+1}"] = jax.random.uniform(
            keys[2 * i + 1], (fan_out,), jnp.float32, -bound, bound)
    return params


def _reference(x2d_f32, kparams, n_cls):
    """Plain-JAX reference with the same bf16-rounded weights (f32 math)."""
    w1f = kparams["w1"].astype(jnp.float32)
    w2f = kparams["w2"].astype(jnp.float32)
    w3f = kparams["w3"].astype(jnp.float32)[:, :n_cls]
    h = jnp.maximum(x2d_f32 @ w1f + kparams["b1"], 0.0)
    h = jnp.maximum(h @ w2f + kparams["b2"], 0.0)
    return h @ w3f + kparams["b3"][:, :n_cls]


if __name__ == "__main__":
    key = jax.random.PRNGKey(0)
    k_x, k_x2, k_p = jax.random.split(key, 3)

    n_inputs = 3 * 32 * 32
    n_hidden = [128, 64]
    n_classes = 10

    params = init_params(k_p, n_inputs, n_hidden, n_classes)
    kparams, n_cls = prepare_params(params)   # one-time weight conversion

    # Case 1: f32 NCHW input (PyTorch parity path), tiny batch.
    batch = 2
    x = jax.random.normal(k_x, (batch, 3, 32, 32), dtype=jnp.float32)
    out = jax.block_until_ready(mlp_forward(x, kparams, n_classes=n_cls))
    ref = _reference(x.reshape(batch, n_inputs), kparams, n_cls)
    assert out.shape == (batch, n_classes)
    assert jnp.allclose(out, ref, atol=5e-2, rtol=5e-2)

    # Case 2: bf16 input with a batch that doesn't divide the tile
    # (exercises the cdiv-grid partial block and the 16-sublane bf16 path).
    batch2 = 50
    x2 = jax.random.normal(k_x2, (batch2, 3, 32, 32), dtype=jnp.float32)
    x2_bf16 = x2.astype(jnp.bfloat16)
    out2 = jax.block_until_ready(mlp_forward(x2_bf16, kparams, n_classes=n_cls))
    ref2 = _reference(x2_bf16.astype(jnp.float32).reshape(batch2, n_inputs),
                      kparams, n_cls)
    assert out2.shape == (batch2, n_classes)
    assert jnp.allclose(out2, ref2, atol=5e-2, rtol=5e-2)

    print("KERNEL_OK")
</pallas_src>

<mosaic_0001>
module attributes {stable_mosaic.version = 11 : i64} {
  func.func @_mlp_kernel(%arg0: i32, %arg1: memref<8x3072xf32, #tpu.memory_space<vmem>>, %arg2: memref<3072x128xbf16, #tpu.memory_space<vmem>>, %arg3: memref<1x128xf32, #tpu.memory_space<vmem>>, %arg4: memref<128x64xbf16, #tpu.memory_space<vmem>>, %arg5: memref<1x64xf32, #tpu.memory_space<vmem>>, %arg6: memref<64x128xbf16, #tpu.memory_space<vmem>>, %arg7: memref<1x128xf32, #tpu.memory_space<vmem>>, %arg8: memref<8x128xf32, #tpu.memory_space<vmem>>) attributes {dimension_semantics = [#tpu.dimension_semantics<parallel>], iteration_bounds = array<i64: 1>, scalar_prefetch = 0 : i64, scratch_operands = 0 : i64, tpu.core_type = #tpu.core_type<tc>, window_params = [{transform_indices = @transform_0, window_bounds = array<i64: 8, 3072>}, {pipeline_mode = #tpu.pipeline_mode<synchronous>, transform_indices = @transform_1, window_bounds = array<i64: 3072, 128>}, {pipeline_mode = #tpu.pipeline_mode<synchronous>, transform_indices = @transform_2, window_bounds = array<i64: 1, 128>}, {pipeline_mode = #tpu.pipeline_mode<synchronous>, transform_indices = @transform_3, window_bounds = array<i64: 128, 64>}, {pipeline_mode = #tpu.pipeline_mode<synchronous>, transform_indices = @transform_4, window_bounds = array<i64: 1, 64>}, {pipeline_mode = #tpu.pipeline_mode<synchronous>, transform_indices = @transform_5, window_bounds = array<i64: 64, 128>}, {pipeline_mode = #tpu.pipeline_mode<synchronous>, transform_indices = @transform_6, window_bounds = array<i64: 1, 128>}, {transform_indices = @transform_7, window_bounds = array<i64: 8, 128>}]} {
    %c0 = arith.constant 0 : index
    %c0_0 = arith.constant 0 : index
    %0 = vector.load %arg1[%c0, %c0_0] : memref<8x3072xf32, #tpu.memory_space<vmem>>, vector<8x3072xf32>
    %1 = arith.truncf %0 : vector<8x3072xf32> to vector<8x3072xbf16>
    %c0_1 = arith.constant 0 : index
    %c0_2 = arith.constant 0 : index
    %2 = vector.load %arg2[%c0_1, %c0_2] : memref<3072x128xbf16, #tpu.memory_space<vmem>>, vector<3072x128xbf16>
    %cst = arith.constant dense<0.000000e+00> : vector<8x128xf32>
    %3 = tpu.matmul %1, %2, %cst {dimension_numbers = #tpu.dot_dimension_numbers<[1], [0], [0], [1], [0, 0, 1, 1], [], []>} : vector<8x3072xbf16>, vector<3072x128xbf16>, vector<8x128xf32> -> vector<8x128xf32>
    %c0_3 = arith.constant 0 : index
    %c0_4 = arith.constant 0 : index
    %4 = vector.load %arg3[%c0_3, %c0_4] : memref<1x128xf32, #tpu.memory_space<vmem>>, vector<1x128xf32>
    %5 = vector.broadcast %4 : vector<1x128xf32> to vector<8x128xf32>
    %6 = arith.addf %3, %5 : vector<8x128xf32>
    %cst_5 = arith.constant 0.000000e+00 : f32
    %7 = vector.broadcast %cst_5 : f32 to vector<8x128xf32>
    %8 = arith.maximumf %6, %7 : vector<8x128xf32>
    %9 = arith.truncf %8 : vector<8x128xf32> to vector<8x128xbf16>
    %c0_6 = arith.constant 0 : index
    %c0_7 = arith.constant 0 : index
    %10 = vector.load %arg4[%c0_6, %c0_7] : memref<128x64xbf16, #tpu.memory_space<vmem>>, vector<128x64xbf16>
    %cst_8 = arith.constant dense<0.000000e+00> : vector<8x64xf32>
    %11 = tpu.matmul %9, %10, %cst_8 {dimension_numbers = #tpu.dot_dimension_numbers<[1], [0], [0], [1], [0, 0, 1, 1], [], []>} : vector<8x128xbf16>, vector<128x64xbf16>, vector<8x64xf32> -> vector<8x64xf32>
    %c0_9 = arith.constant 0 : index
    %c0_10 = arith.constant 0 : index
    %12 = vector.load %arg5[%c0_9, %c0_10] : memref<1x64xf32, #tpu.memory_space<vmem>>, vector<1x64xf32>
    %13 = vector.broadcast %12 : vector<1x64xf32> to vector<8x64xf32>
    %14 = arith.addf %11, %13 : vector<8x64xf32>
    %cst_11 = arith.constant 0.000000e+00 : f32
    %15 = vector.broadcast %cst_11 : f32 to vector<8x64xf32>
    %16 = arith.maximumf %14, %15 : vector<8x64xf32>
    %17 = arith.truncf %16 : vector<8x64xf32> to vector<8x64xbf16>
    %c0_12 = arith.constant 0 : index
    %c0_13 = arith.constant 0 : index
    %18 = vector.load %arg6[%c0_12, %c0_13] : memref<64x128xbf16, #tpu.memory_space<vmem>>, vector<64x128xbf16>
    %cst_14 = arith.constant dense<0.000000e+00> : vector<8x128xf32>
    %19 = tpu.matmul %17, %18, %cst_14 {dimension_numbers = #tpu.dot_dimension_numbers<[1], [0], [0], [1], [0, 0, 1, 1], [], []>} : vector<8x64xbf16>, vector<64x128xbf16>, vector<8x128xf32> -> vector<8x128xf32>
    %c0_15 = arith.constant 0 : index
    %c0_16 = arith.constant 0 : index
    %20 = vector.load %arg7[%c0_15, %c0_16] : memref<1x128xf32, #tpu.memory_space<vmem>>, vector<1x128xf32>
    %21 = vector.broadcast %20 : vector<1x128xf32> to vector<8x128xf32>
    %22 = arith.addf %19, %21 : vector<8x128xf32>
    %c0_17 = arith.constant 0 : index
    %c0_18 = arith.constant 0 : index
    %23 = vector.load %arg8[%c0_17, %c0_18] : memref<8x128xf32, #tpu.memory_space<vmem>>, vector<8x128xf32>
    tpu.vector_store %arg8[%c0_17, %c0_18], %22 {strides = array<i32>} : memref<8x128xf32, #tpu.memory_space<vmem>>, vector<8x128xf32>,
    return
  }
  func.func @transform_0(%arg0: i32) -> (i32, i32) {
    %c0_i32 = arith.constant 0 : i32
    %c0_i32_0 = arith.constant 0 : i32
    return %arg0, %c0_i32 : i32, i32
  }
  func.func @transform_1(%arg0: i32) -> (i32, i32) {
    %c0_i32 = arith.constant 0 : i32
    %c0_i32_0 = arith.constant 0 : i32
    %c0_i32_1 = arith.constant 0 : i32
    return %c0_i32, %c0_i32_0 : i32, i32
  }
  func.func @transform_2(%arg0: i32) -> (i32, i32) {
    %c0_i32 = arith.constant 0 : i32
    %c0_i32_0 = arith.constant 0 : i32
    %c0_i32_1 = arith.constant 0 : i32
    return %c0_i32, %c0_i32_0 : i32, i32
  }
  func.func @transform_3(%arg0: i32) -> (i32, i32) {
    %c0_i32 = arith.constant 0 : i32
    %c0_i32_0 = arith.constant 0 : i32
    %c0_i32_1 = arith.constant 0 : i32
    return %c0_i32, %c0_i32_0 : i32, i32
  }
  func.func @transform_4(%arg0: i32) -> (i32, i32) {
    %c0_i32 = arith.constant 0 : i32
    %c0_i32_0 = arith.constant 0 : i32
    %c0_i32_1 = arith.constant 0 : i32
    return %c0_i32, %c0_i32_0 : i32, i32
  }
  func.func @transform_5(%arg0: i32) -> (i32, i32) {
    %c0_i32 = arith.constant 0 : i32
    %c0_i32_0 = arith.constant 0 : i32
    %c0_i32_1 = arith.constant 0 : i32
    return %c0_i32, %c0_i32_0 : i32, i32
  }
  func.func @transform_6(%arg0: i32) -> (i32, i32) {
    %c0_i32 = arith.constant 0 : i32
    %c0_i32_0 = arith.constant 0 : i32
    %c0_i32_1 = arith.constant 0 : i32
    return %c0_i32, %c0_i32_0 : i32, i32
  }
  func.func @transform_7(%arg0: i32) -> (i32, i32) {
    %c0_i32 = arith.constant 0 : i32
    %c0_i32_0 = arith.constant 0 : i32
    return %arg0, %c0_i32 : i32, i32
  }
}

</mosaic_0001>

<bundles_post_ra>
// kernel: mlp_forward.1
= control target key start
LH: loop header
LB: loop body
LE: loop exit
PB: predicated region body
PF: predicated region fallthrough
CT: control target
= control target key end

     0   :  { %12 = vsyncpa [#allocation3], 0  ;;  %s3616_s0 = inlined_call_operand.vmem [shape: f32[2,3072], index: 0, kind: input, shape index: {}]   ;;  %s3617_s1 = inlined_call_operand.hbm [shape: bf16[3072,128], index: 1, kind: input, shape index: {}]   ;;  %s3618_s2 = inlined_call_operand.vmem [shape: f32[1,128], index: 2, kind: input, shape index: {}]   ;;  %s3619_s3 = inlined_call_operand.vmem [shape: bf16[128,64], index: 3, kind: input, shape index: {}]   ;;  %s3620_s4 = inlined_call_operand.vmem [shape: f32[1,64], index: 4, kind: input, shape index: {}]   ;;  %s3621_s5 = inlined_call_operand.vmem [shape: bf16[64,128], index: 5, kind: input, shape index: {}]   ;;  %s3622_s6 = inlined_call_operand.vmem [shape: f32[1,128], index: 6, kind: input, shape index: {}]   ;;  %s3623_s7 = inlined_call_operand.hbm [shape: f32[2,128], index: 7, kind: output, shape index: {}]  }
   0x1   :  { %13 = vsyncpa [#allocation4], 0  ;;  %s3404_s24 = smov [#allocation2]  }
   0x2   :  { %s21_s25 = sshll.u32 %s3404_s24, 4  ;;  %s22_s25 = int_to_ptr.vmem [resolvable:$true] %s21_s25 }
   0x3   :  { %s3368_s26 = scalar_lea.vmem %s22_s25, 24576  ;;  %p3373_p1 = scmp.lt.s32.totalorder %s22_s25, %s22_s25 }
   0x4   :  { %p3369_p0 = scmp.ne.s32.totalorder %s22_s25, %s3368_s26  ;;  %p3374_p2 = scmp.lt.s32.totalorder %s3368_s26, %s3368_s26 }
   0x6   :  { %p3375_p3 = por %p3374_p2, %p3373_p1 }
   0x8   :  { %p3376_p4 = pnand %p3375_p3, %p3369_p0 }
   0xa   :  { %3379 = shalt.err (!%p3376_p4)
}
   0xb   :  { %s3405_s27 = smov 64   ;;  %s3406_s28 = smov 4  }
   0xc   :  { %27 = dma.hbm_to_vmem [thread:$0]  %s3617_s1, 24576, %s22_s25, [#allocation3], %s3405_s27, %s3405_s27, %s3406_s28  }
   0xd   :  { %3400 = dma.done.wait [#allocation3], 24576  }
   0xe   :  { %3401 = vsyncadd [#allocation3], 4294942720  ;;  %v3120_v0 = vld [vmem:[#allocation2 + $0x78] sm:$0xff]   ;;  %v3124_v4 = vld [vmem:[#allocation2 + $0x70] sm:$0xff]   ;;  %v3407_v24 = vmov 1983009808   ;;  %v97_v26 = vlaneseq }
   0xf   :  { %v3121_v1 = vld [vmem:[#allocation2 + $0xf8] sm:$0xff]   ;;  %2801 = vmatprep.subr.bf16.mxu0 %v3120_v0  ;;  %v3125_v5 = vld [vmem:[#allocation2 + $0xf0] sm:$0xff]   ;;  %v3128_v8 = vld [vmem:[#allocation2 + $0x68] sm:$0xff]   ;;  %v95_v25 = vunpack.c.l.s4 %v3407_v24  ;;  %vm3409_vm0 = vmmov 0   ;;  %vm2531_vm1 = vcmask 523264  }
  0x10   :  { %v3122_v2 = vld [vmem:[#allocation2 + $0x38] sm:$0xff]   ;;  %2823 = vmatprep.subr.bf16.mxu1 %v3121_v1  ;;  %v3126_v6 = vld [vmem:[#allocation2 + $0x30] sm:$0xff]   ;;  %v3129_v9 = vld [vmem:[#allocation2 + $0xe8] sm:$0xff]   ;;  %v98_v32 = vshrl.u32 %v97_v26, 7 }
  0x11   :  { %v3123_v3 = vld [vmem:[#allocation2 + $0xb8] sm:$0xff]   ;;  %2802 = vmatpush3.bf16.msra.mxu0 %v3122_v2  ;;  %v3127_v7 = vld [vmem:[#allocation2 + $0xb0] sm:$0xff]   ;;  %v3130_v10 = vld [vmem:[#allocation2 + $0x28] sm:$0xff]   ;;  %v96_v31 = vunpack.c.0.s8 %v95_v25 }
  0x12   :  { %2824 = vmatpush3.bf16.msra.mxu1 %v3123_v3  ;;  %2803 = vmatprep.subr.bf16.mxu0 %v3124_v4  ;;  %v3131_v11 = vld [vmem:[#allocation2 + $0xa8] sm:$0xff]   ;;  %v3132_v12 = vld [vmem:[#allocation2 + $0x60] sm:$0xff]   ;;  %v3136_v16 = vld [vmem:[#allocation2 + $0x58] sm:$0xff]  }
  0x13   :  { %2825 = vmatprep.subr.bf16.mxu1 %v3125_v5  ;;  %v3133_v13 = vld [vmem:[#allocation2 + $0xe0] sm:$0xff]   ;;  %v3137_v17 = vld [vmem:[#allocation2 + $0xd8] sm:$0xff]   ;;  %v3140_v20 = vld [vmem:[#allocation2 + $0x50] sm:$0xff]   ;;  %v3456_v37 = vsub.s32 %v96_v31, %v98_v32 }
  0x14   :  { %v3134_v14 = vld [vmem:[#allocation2 + $0x20] sm:$0xff]   ;;  %v3138_v18 = vld [vmem:[#allocation2 + $0x18] sm:$0xff]   ;;  %v3141_v21 = vld [vmem:[#allocation2 + $0xd0] sm:$0xff]  }
  0x15   :  { %2804 = vmatpush3.bf16.msra.mxu0 %v3126_v6  ;;  %v3135_v15 = vld [vmem:[#allocation2 + $0xa0] sm:$0xff]   ;;  %v3139_v19 = vld [vmem:[#allocation2 + $0x98] sm:$0xff]   ;;  %v3142_v22 = vld [vmem:[#allocation2 + $0x10] sm:$0xff]  }
  0x16   :  { %2826 = vmatpush3.bf16.msra.mxu1 %v3127_v7  ;;  %2805 = vmatprep.subr.bf16.mxu0 %v3128_v8  ;;  %v3143_v23 = vld [vmem:[#allocation2 + $0x90] sm:$0xff]   ;;  %v3144_v27 = vld [vmem:[#allocation2 + $0x48] sm:$0xff]   ;;  %v3148_v33 = vld [vmem:[#allocation2 + $0x40] sm:$0xff]  }
  0x17   :  { %2827 = vmatprep.subr.bf16.mxu1 %v3129_v9  ;;  %v3145_v28 = vld [vmem:[#allocation2 + $0xc8] sm:$0xff]   ;;  %v3149_v34 = vld [vmem:[#allocation2 + $0xc0] sm:$0xff]   ;;  %v3158_v44 = vld [vmem:[#allocation2 + $0x178] sm:$0xff]  }
  0x18   :  { %v3146_v29 = vld [vmem:[#allocation2 + $0x8] sm:$0xff]   ;;  %v3150_v35 = vld [vmem:[#allocation2] sm:$0xff]   ;;  %v3159_v47 = vld [vmem:[#allocation2 + $0x1f8] sm:$0xff]  }
  0x19   :  { %2806 = vmatpush3.bf16.msra.mxu0 %v3130_v10  ;;  %v3147_v30 = vld [vmem:[#allocation2 + $0x88] sm:$0xff]   ;;  %v3151_v36 = vld [vmem:[#allocation2 + $0x80] sm:$0xff]   ;;  %v3160_v50 = vld [vmem:[#allocation2 + $0x138] sm:$0xff]  }
  0x1a   :  { %2828 = vmatpush3.bf16.msra.mxu1 %v3131_v11  ;;  %2807 = vmatprep.subr.bf16.mxu0 %v3132_v12  ;;  %v3152_v38 = vld [vmem:[%s3616_s0] ss:$48 sps:$4 sm:$0xff]   ;;  %v3156_v40 = vld [vmem:[%s3616_s0 + $0x4] ss:$48 sps:$4 sm:$0xff]   ;;  %v3161_v53 = vld [vmem:[#allocation2 + $0x1b8] sm:$0xff]  }
  0x1b   :  { %2829 = vmatprep.subr.bf16.mxu1 %v3133_v13  ;;  %v3154_v39 = vld [vmem:[%s3616_s0 + $0x60] ss:$48 sps:$4 sm:$0xff]   ;;  %v3157_v41 = vld [vmem:[%s3616_s0 + $0x64] ss:$48 sps:$4 sm:$0xff]   ;;  %v100_v42 = vrot.slane %v3152_v38, %v3456_v37  ;;  %v107_v45 = vrot.slane %v3156_v40, %v3456_v37  ;;  %v3166_v62 = vld [vmem:[#allocation2 + $0x168] sm:$0xff]  }
  0x1c   :  { %v114_v43 = vrot.slane %v3154_v39, %v3456_v37  ;;  %v121_v46 = vrot.slane %v3157_v41, %v3456_v37  ;;  %v3162_v56 = vld [vmem:[#allocation2 + $0x170] sm:$0xff]   ;;  %v3167_v63 = vld [vmem:[#allocation2 + $0x1e8] sm:$0xff]   ;;  %v3170_v2 = vld [vmem:[#allocation2 + $0x160] sm:$0xff]  }
  0x1d   :  { %2808 = vmatpush3.bf16.msra.mxu0 %v3134_v14  ;;  %v3163_v59 = vld [vmem:[#allocation2 + $0x1f0] sm:$0xff]   ;;  %v3168_v0 = vld [vmem:[#allocation2 + $0x128] sm:$0xff]   ;;  %v3171_v3 = vld [vmem:[#allocation2 + $0x1e0] sm:$0xff]  }
  0x1e   :  { %2830 = vmatpush3.bf16.msra.mxu1 %v3135_v15  ;;  %2809 = vmatprep.subr.bf16.mxu0 %v3136_v16  ;;  %v123_v48 = vcombine.high %v100_v42, %v114_v43  ;;  %v122_v49 = vcombine.low %v100_v42, %v114_v43  ;;  %v125_v51 = vcombine.high %v107_v45, %v121_v46  ;;  %v3164_v60 = vld [vmem:[#allocation2 + $0x130] sm:$0xff]   ;;  %v3169_v1 = vld [vmem:[#allocation2 + $0x1a8] sm:$0xff]   ;;  %v3172_v4 = vld [vmem:[#allocation2 + $0x120] sm:$0xff]  }
  0x1f   :  { %2831 = vmatprep.subr.bf16.mxu1 %v3137_v17  ;;  %v124_v52 = vcombine.low %v107_v45, %v121_v46  ;;  %v3165_v61 = vld [vmem:[#allocation2 + $0x1b0] sm:$0xff]   ;;  %v3173_v5 = vld [vmem:[#allocation2 + $0x1a0] sm:$0xff]   ;;  %v3174_v6 = vld [vmem:[#allocation2 + $0x158] sm:$0xff]  }
  0x20   :  { %v331_v54 = vpack.c.bf16 %v123_v48, %v123_v48  ;;  %v330_v55 = vpack.c.bf16 %v122_v49, %v122_v49  ;;  %v333_v57 = vpack.c.bf16 %v125_v51, %v125_v51  ;;  %v3175_v7 = vld [vmem:[#allocation2 + $0x1d8] sm:$0xff]   ;;  %v3178_v10 = vld [vmem:[#allocation2 + $0x150] sm:$0xff]   ;;  %v3182_v14 = vld [vmem:[#allocation2 + $0x148] sm:$0xff]  }
  0x21   :  { %2810 = vmatpush3.bf16.msra.mxu0 %v3138_v18  ;;  %v332_v58 = vpack.c.bf16 %v124_v52, %v124_v52  ;;  %v3176_v8 = vld [vmem:[#allocation2 + $0x118] sm:$0xff]   ;;  %v3179_v11 = vld [vmem:[#allocation2 + $0x1d0] sm:$0xff]   ;;  %v3183_v15 = vld [vmem:[#allocation2 + $0x1c8] sm:$0xff]  }
  0x22   :  { %2832 = vmatpush3.bf16.msra.mxu1 %v3139_v19  ;;  %2811 = vmatprep.subr.bf16.mxu0 %v3140_v20  ;;  %v3177_v9 = vld [vmem:[#allocation2 + $0x198] sm:$0xff]   ;;  %v3180_v12 = vld [vmem:[#allocation2 + $0x110] sm:$0xff]   ;;  %v3184_v16 = vld [vmem:[#allocation2 + $0x108] sm:$0xff]  }
  0x23   :  { %2833 = vmatprep.subr.bf16.mxu1 %v3141_v21  ;;  %1929 = vmatprep.mubr.bf16.mxu0 %v331_v54  ;;  %v3181_v13 = vld [vmem:[#allocation2 + $0x190] sm:$0xff]   ;;  %v3185_v17 = vld [vmem:[#allocation2 + $0x188] sm:$0xff]   ;;  %v3186_v18 = vld [vmem:[#allocation2 + $0x140] sm:$0xff]  }
  0x24   :  { %1969 = vmatprep.mubr.bf16.mxu1 %v333_v57  ;;  %v3187_v19 = vld [vmem:[#allocation2 + $0x1c0] sm:$0xff]   ;;  %v3194_v24 = vld [vmem:[%s3616_s0 + $0xc] ss:$48 sps:$4 sm:$0xff]   ;;  %v3200_v41 = vld [vmem:[#allocation2 + $0x270] sm:$0xff]  }
  0x25   :  { %2812 = vmatpush3.bf16.msra.mxu0 %v3142_v22  ;;  %v3188_v20 = vld [vmem:[#allocation2 + $0x100] sm:$0xff]   ;;  %v3190_v22 = vld [vmem:[%s3616_s0 + $0x8] ss:$48 sps:$4 sm:$0xff]   ;;  %v3195_v25 = vld [vmem:[%s3616_s0 + $0x6c] ss:$48 sps:$4 sm:$0xff]  }
  0x26   :  { %2834 = vmatpush3.bf16.msra.mxu1 %v3143_v23  ;;  %2813 = vmatprep.subr.bf16.mxu0 %v3144_v27  ;;  %v3189_v21 = vld [vmem:[#allocation2 + $0x180] sm:$0xff]   ;;  %v3192_v23 = vld [vmem:[%s3616_s0 + $0x68] ss:$48 sps:$4 sm:$0xff]   ;;  %v136_v26 = vrot.slane %v3190_v22, %v3456_v37  ;;  %v3202_v45 = vld [vmem:[#allocation2 + $0x230] sm:$0xff]  }
  0x27   :  { %2835 = vmatprep.subr.bf16.mxu1 %v3145_v28  ;;  %v150_v27 = vrot.slane %v3192_v23, %v3456_v37  ;;  %v143_v28 = vrot.slane %v3194_v24, %v3456_v37  ;;  %v3197_v31 = vld [vmem:[#allocation2 + $0x2f8] sm:$0xff]   ;;  %v3203_v46 = vld [vmem:[#allocation2 + $0x2b0] sm:$0xff]   ;;  %v3205_v48 = vld [vmem:[#allocation2 + $0x2e8] sm:$0xff]  }
  0x28   :  { %v3199_v38 = vld [vmem:[#allocation2 + $0x2b8] sm:$0xff]   ;;  %v3206_v49 = vld [vmem:[#allocation2 + $0x228] sm:$0xff]   ;;  %v3208_v51 = vld [vmem:[#allocation2 + $0x260] sm:$0xff]  }
  0x29   :  { %2814 = vmatpush3.bf16.msra.mxu0 %v3146_v29  ;;  %v3196_v29 = vld [vmem:[#allocation2 + $0x278] sm:$0xff]   ;;  %v159_v32 = vcombine.high %v136_v26, %v150_v27  ;;  %v3209_v52 = vld [vmem:[#allocation2 + $0x2e0] sm:$0xff]  }
  0x2a   :  { %2836 = vmatpush3.bf16.msra.mxu1 %v3147_v30  ;;  %2815 = vmatprep.subr.bf16.mxu0 %v3148_v33  ;;  %v157_v30 = vrot.slane %v3195_v25, %v3456_v37  ;;  %v158_v33 = vcombine.low %v136_v26, %v150_v27  ;;  %v3211_v54 = vld [vmem:[#allocation2 + $0x2a0] sm:$0xff]   ;;  %v3214_v57 = vld [vmem:[#allocation2 + $0x218] sm:$0xff]   ;;  %v3238_v27 = vld [vmem:[#allocation2 + $0x370] sm:$0xff]  }
  0x2b   :  { %2837 = vmatprep.subr.bf16.mxu1 %v3149_v34  ;;  %v3198_v34 = vld [vmem:[#allocation2 + $0x238] sm:$0xff]   ;;  %v335_v39 = vpack.c.bf16 %v159_v32, %v159_v32  ;;  %v3243_v32 = vld [vmem:[#allocation2 + $0x3e8] sm:$0xff]  }
  0x2c   :  { %v334_v40 = vpack.c.bf16 %v158_v33, %v158_v33  ;;  %v3237_v22 = vld [vmem:[#allocation2 + $0x3b8] sm:$0xff]   ;;  %v3244_v33 = vld [vmem:[#allocation2 + $0x328] sm:$0xff]  }
  0x2d   :  { %2816 = vmatpush3.bf16.msra.mxu0 %v3150_v35  ;;  %v161_v35 = vcombine.high %v143_v28, %v157_v30 }
  0x2e   :  { %2838 = vmatpush3.bf16.msra.mxu1 %v3151_v36  ;;  %2845 = vmatprep.subr.bf16.mxu0 %v3158_v44  ;;  %v160_v36 = vcombine.low %v143_v28, %v157_v30  ;;  %v3201_v44 = vld [vmem:[#allocation2 + $0x2f0] sm:$0xff]  }
  0x2f   :  { %2867 = vmatprep.subr.bf16.mxu1 %v3159_v47  ;;  %v337_v42 = vpack.c.bf16 %v161_v35, %v161_v35  ;;  %v3204_v47 = vld [vmem:[#allocation2 + $0x268] sm:$0xff]   ;;  %v3239_v28 = vld [vmem:[#allocation2 + $0x3f0] sm:$0xff]   ;;  %v3246_v35 = vld [vmem:[#allocation2 + $0x360] sm:$0xff]  }
  0x30   :  { %1930 = vmatmul.mubr.bf16.vlgmr.msra.gmra.mxu0 %v330_v55  ;;  %v336_v43 = vpack.c.bf16 %v160_v36, %v160_v36  ;;  %v3212_v55 = vld [vmem:[#allocation2 + $0x258] sm:$0xff]   ;;  %v3241_v30 = vld [vmem:[#allocation2 + $0x3b0] sm:$0xff]   ;;  %v3247_v36 = vld [vmem:[#allocation2 + $0x3e0] sm:$0xff]  }
  0x31   :  { %1970 = vmatmul.mubr.bf16.vlgmr.msra.gmra.mxu1 %v332_v58  ;;  %2846 = vmatpush3.bf16.msra.mxu0 %v3160_v50  ;;  %v3207_v50 = vld [vmem:[#allocation2 + $0x2a8] sm:$0xff]   ;;  %v3215_v58 = vld [vmem:[#allocation2 + $0x298] sm:$0xff]  }
  0x32   :  { %2868 = vmatpush3.bf16.msra.mxu1 %v3161_v53  ;;  %2847 = vmatprep.subr.bf16.mxu0 %v3162_v56  ;;  %v3210_v53 = vld [vmem:[#allocation2 + $0x220] sm:$0xff]   ;;  %v3213_v56 = vld [vmem:[#allocation2 + $0x2d8] sm:$0xff]  }
  0x33   :  { %2869 = vmatprep.subr.bf16.mxu1 %v3163_v59  ;;  %2009 = vmatprep.mubr.bf16.mxu0 %v335_v39  ;;  %v3216_v59 = vld [vmem:[#allocation2 + $0x250] sm:$0xff]   ;;  %v3249_v39 = vld [vmem:[#allocation2 + $0x3a0] sm:$0xff]  }
  0x34   :  { %2049 = vmatprep.mubr.bf16.mxu1 %v337_v42  ;;  %v3252_v42 = vld [vmem:[#allocation2 + $0x318] sm:$0xff]  }
  0x35   :  { %2848 = vmatpush3.bf16.msra.mxu0 %v3164_v60  ;;  %v3217_v60 = vld [vmem:[#allocation2 + $0x2d0] sm:$0xff]  }
  0x36   :  { %2870 = vmatpush3.bf16.msra.mxu1 %v3165_v61  ;;  %2849 = vmatprep.subr.bf16.mxu0 %v3166_v62  ;;  %v3218_v61 = vld [vmem:[#allocation2 + $0x210] sm:$0xff]  }
  0x37   :  { %2871 = vmatprep.subr.bf16.mxu1 %v3167_v63  ;;  %v3219_v62 = vld [vmem:[#allocation2 + $0x290] sm:$0xff]   ;;  %v3220_v63 = vld [vmem:[#allocation2 + $0x248] sm:$0xff]  }
  0x39   :  { %2850 = vmatpush3.bf16.msra.mxu0 %v3168_v0  ;;  %v3221_v0 = vld [vmem:[#allocation2 + $0x2c8] sm:$0xff]  }
  0x3a   :  { %2872 = vmatpush3.bf16.msra.mxu1 %v3169_v1  ;;  %2851 = vmatprep.subr.bf16.mxu0 %v3170_v2  ;;  %v3222_v1 = vld [vmem:[#allocation2 + $0x208] sm:$0xff]  }
  0x3b   :  { %2873 = vmatprep.subr.bf16.mxu1 %v3171_v3  ;;  %v3223_v2 = vld [vmem:[#allocation2 + $0x288] sm:$0xff]   ;;  %v3224_v3 = vld [vmem:[#allocation2 + $0x240] sm:$0xff]  }
  0x3d   :  { %2852 = vmatpush3.bf16.msra.mxu0 %v3172_v4  ;;  %v3225_v4 = vld [vmem:[#allocation2 + $0x2c0] sm:$0xff]  }
  0x3e   :  { %2874 = vmatpush3.bf16.msra.mxu1 %v3173_v5  ;;  %2853 = vmatprep.subr.bf16.mxu0 %v3174_v6  ;;  %v3226_v5 = vld [vmem:[#allocation2 + $0x200] sm:$0xff]  }
  0x3f   :  { %2875 = vmatprep.subr.bf16.mxu1 %v3175_v7  ;;  %v3227_v6 = vld [vmem:[#allocation2 + $0x280] sm:$0xff]  }
  0x40   :  { %v3228_v7 = vld [vmem:[%s3616_s0 + $0x10] ss:$48 sps:$4 sm:$0xff]  }
  0x41   :  { %2854 = vmatpush3.bf16.msra.mxu0 %v3176_v8  ;;  %v3230_v8 = vld [vmem:[%s3616_s0 + $0x70] ss:$48 sps:$4 sm:$0xff]  }
  0x42   :  { %2876 = vmatpush3.bf16.msra.mxu1 %v3177_v9  ;;  %2855 = vmatprep.subr.bf16.mxu0 %v3178_v10  ;;  %v3232_v9 = vld [vmem:[%s3616_s0 + $0x14] ss:$48 sps:$4 sm:$0xff]  }
  0x43   :  { %2877 = vmatprep.subr.bf16.mxu1 %v3179_v11  ;;  %v3233_v10 = vld [vmem:[%s3616_s0 + $0x74] ss:$48 sps:$4 sm:$0xff]   ;;  %v172_v11 = vrot.slane %v3228_v7, %v3456_v37  ;;  %v3275_v7 = vld [vmem:[#allocation2 + $0x4b8] sm:$0xff]  }
  0x45   :  { %2856 = vmatpush3.bf16.msra.mxu0 %v3180_v12  ;;  %v3234_v12 = vld [vmem:[#allocation2 + $0x378] sm:$0xff]  }
  0x46   :  { %2878 = vmatpush3.bf16.msra.mxu1 %v3181_v13  ;;  %2857 = vmatprep.subr.bf16.mxu0 %v3182_v14  ;;  %v186_v13 = vrot.slane %v3230_v8, %v3456_v37  ;;  %v179_v14 = vrot.slane %v3232_v9, %v3456_v37 }
  0x47   :  { %2879 = vmatprep.subr.bf16.mxu1 %v3183_v15  ;;  %v193_v15 = vrot.slane %v3233_v10, %v3456_v37  ;;  %v3276_v10 = vld [vmem:[#allocation2 + $0x470] sm:$0xff]  }
  0x49   :  { %2858 = vmatpush3.bf16.msra.mxu0 %v3184_v16  ;;  %v3235_v16 = vld [vmem:[#allocation2 + $0x3f8] sm:$0xff]  }
  0x4a   :  { %2880 = vmatpush3.bf16.msra.mxu1 %v3185_v17  ;;  %2859 = vmatprep.subr.bf16.mxu0 %v3186_v18  ;;  %v195_v17 = vcombine.high %v172_v11, %v186_v13  ;;  %v197_v18 = vcombine.high %v179_v14, %v193_v15 }
  0x4b   :  { %2881 = vmatprep.subr.bf16.mxu1 %v3187_v19  ;;  %v194_v19 = vcombine.low %v172_v11, %v186_v13  ;;  %v3277_v13 = vld [vmem:[#allocation2 + $0x4f0] sm:$0xff]  }
  0x4c   :  { %v339_v23 = vpack.c.bf16 %v195_v17, %v195_v17  ;;  %v341_v24 = vpack.c.bf16 %v197_v18, %v197_v18  ;;  %v3281_v17 = vld [vmem:[#allocation2 + $0x4e8] sm:$0xff]  }
  0x4d   :  { %2860 = vmatpush3.bf16.msra.mxu0 %v3188_v20  ;;  %v196_v20 = vcombine.low %v179_v14, %v193_v15  ;;  %v338_v25 = vpack.c.bf16 %v194_v19, %v194_v19  ;;  %v3278_v14 = vld [vmem:[#allocation2 + $0x430] sm:$0xff]   ;;  %v3282_v18 = vld [vmem:[#allocation2 + $0x428] sm:$0xff]  }
  0x4e   :  { %2882 = vmatpush3.bf16.msra.mxu1 %v3189_v21  ;;  %2889 = vmatprep.subr.bf16.mxu0 %v3196_v29  ;;  %v3236_v21 = vld [vmem:[#allocation2 + $0x338] sm:$0xff]   ;;  %v3240_v29 = vld [vmem:[#allocation2 + $0x330] sm:$0xff]   ;;  %v3283_v19 = vld [vmem:[#allocation2 + $0x4a8] sm:$0xff]  }
  0x4f   :  { %2911 = vmatprep.subr.bf16.mxu1 %v3197_v31  ;;  %v340_v26 = vpack.c.bf16 %v196_v20, %v196_v20  ;;  %v3242_v31 = vld [vmem:[#allocation2 + $0x368] sm:$0xff]   ;;  %v3279_v15 = vld [vmem:[#allocation2 + $0x4b0] sm:$0xff]   ;;  %v3284_v20 = vld [vmem:[#allocation2 + $0x460] sm:$0xff]  }
  0x50   :  { %2010 = vmatmul.mubr.bf16.vlgmr.msra.gmra.mxu0 %v334_v40  ;;  %v3250_v40 = vld [vmem:[#allocation2 + $0x358] sm:$0xff]  }
  0x51   :  { %2050 = vmatmul.mubr.bf16.vlgmr.msra.gmra.mxu1 %v336_v43  ;;  %2890 = vmatpush3.bf16.msra.mxu0 %v3198_v34  ;;  %v3245_v34 = vld [vmem:[#allocation2 + $0x3a8] sm:$0xff]   ;;  %v3253_v43 = vld [vmem:[#allocation2 + $0x398] sm:$0xff]  }
  0x52   :  { %2912 = vmatpush3.bf16.msra.mxu1 %v3199_v38  ;;  %2891 = vmatprep.subr.bf16.mxu0 %v3200_v41  ;;  %v3248_v38 = vld [vmem:[#allocation2 + $0x320] sm:$0xff]   ;;  %v3251_v41 = vld [vmem:[#allocation2 + $0x3d8] sm:$0xff]  }
  0x53   :  { %2913 = vmatprep.subr.bf16.mxu1 %v3201_v44  ;;  %2089 = vmatprep.mubr.bf16.mxu0 %v339_v23  ;;  %v3254_v44 = vld [vmem:[#allocation2 + $0x350] sm:$0xff]   ;;  %v3287_v23 = vld [vmem:[#allocation2 + $0x4a0] sm:$0xff]  }
  0x54   :  { %2129 = vmatprep.mubr.bf16.mxu1 %v341_v24  ;;  %v3288_v24 = vld [vmem:[#allocation2 + $0x458] sm:$0xff]  }
  0x55   :  { %2892 = vmatpush3.bf16.msra.mxu0 %v3202_v45  ;;  %v3255_v45 = vld [vmem:[#allocation2 + $0x3d0] sm:$0xff]  }
  0x56   :  { %2914 = vmatpush3.bf16.msra.mxu1 %v3203_v46  ;;  %2893 = vmatprep.subr.bf16.mxu0 %v3204_v47  ;;  %v3256_v46 = vld [vmem:[#allocation2 + $0x310] sm:$0xff]  }
  0x57   :  { %2915 = vmatprep.subr.bf16.mxu1 %v3205_v48  ;;  %v3257_v47 = vld [vmem:[#allocation2 + $0x390] sm:$0xff]   ;;  %v3258_v48 = vld [vmem:[#allocation2 + $0x348] sm:$0xff]  }
  0x59   :  { %2894 = vmatpush3.bf16.msra.mxu0 %v3206_v49  ;;  %v3259_v49 = vld [vmem:[#allocation2 + $0x3c8] sm:$0xff]  }
  0x5a   :  { %2916 = vmatpush3.bf16.msra.mxu1 %v3207_v50  ;;  %2895 = vmatprep.subr.bf16.mxu0 %v3208_v51  ;;  %v3260_v50 = vld [vmem:[#allocation2 + $0x308] sm:$0xff]  }
  0x5b   :  { %2917 = vmatprep.subr.bf16.mxu1 %v3209_v52  ;;  %v3261_v51 = vld [vmem:[#allocation2 + $0x388] sm:$0xff]   ;;  %v3262_v52 = vld [vmem:[#allocation2 + $0x340] sm:$0xff]  }
  0x5d   :  { %2896 = vmatpush3.bf16.msra.mxu0 %v3210_v53  ;;  %v3263_v53 = vld [vmem:[#allocation2 + $0x3c0] sm:$0xff]  }
  0x5e   :  { %2918 = vmatpush3.bf16.msra.mxu1 %v3211_v54  ;;  %2897 = vmatprep.subr.bf16.mxu0 %v3212_v55  ;;  %v3264_v54 = vld [vmem:[#allocation2 + $0x300] sm:$0xff]  }
  0x5f   :  { %2919 = vmatprep.subr.bf16.mxu1 %v3213_v56  ;;  %v3265_v55 = vld [vmem:[#allocation2 + $0x380] sm:$0xff]   ;;  %v3266_v56 = vld [vmem:[%s3616_s0 + $0x18] ss:$48 sps:$4 sm:$0xff]  }
  0x61   :  { %2898 = vmatpush3.bf16.msra.mxu0 %v3214_v57  ;;  %v3268_v57 = vld [vmem:[%s3616_s0 + $0x78] ss:$48 sps:$4 sm:$0xff]  }
  0x62   :  { %2920 = vmatpush3.bf16.msra.mxu1 %v3215_v58  ;;  %2899 = vmatprep.subr.bf16.mxu0 %v3216_v59  ;;  %v3270_v58 = vld [vmem:[%s3616_s0 + $0x1c] ss:$48 sps:$4 sm:$0xff]  }
  0x63   :  { %2921 = vmatprep.subr.bf16.mxu1 %v3217_v60  ;;  %v3271_v59 = vld [vmem:[%s3616_s0 + $0x7c] ss:$48 sps:$4 sm:$0xff]   ;;  %v208_v60 = vrot.slane %v3266_v56, %v3456_v37 }
  0x64   :  { %v3313_v56 = vld [vmem:[#allocation2 + $0x5b8] sm:$0xff]  }
  0x65   :  { %2900 = vmatpush3.bf16.msra.mxu0 %v3218_v61  ;;  %v222_v61 = vrot.slane %v3268_v57, %v3456_v37 }
  0x66   :  { %2922 = vmatpush3.bf16.msra.mxu1 %v3219_v62  ;;  %2901 = vmatprep.subr.bf16.mxu0 %v3220_v63  ;;  %v3272_v62 = vld [vmem:[#allocation2 + $0x478] sm:$0xff]   ;;  %v215_v63 = vrot.slane %v3270_v58, %v3456_v37 }
  0x67   :  { %2923 = vmatprep.subr.bf16.mxu1 %v3221_v0  ;;  %v229_v0 = vrot.slane %v3271_v59, %v3456_v37  ;;  %v3314_v59 = vld [vmem:[#allocation2 + $0x570] sm:$0xff]  }
  0x69   :  { %2902 = vmatpush3.bf16.msra.mxu0 %v3222_v1  ;;  %v3273_v1 = vld [vmem:[#allocation2 + $0x4f8] sm:$0xff]  }
  0x6a   :  { %2924 = vmatpush3.bf16.msra.mxu1 %v3223_v2  ;;  %2903 = vmatprep.subr.bf16.mxu0 %v3224_v3  ;;  %v231_v2 = vcombine.high %v208_v60, %v222_v61  ;;  %v230_v3 = vcombine.low %v208_v60, %v222_v61 }
  0x6b   :  { %2925 = vmatprep.subr.bf16.mxu1 %v3225_v4  ;;  %v3274_v4 = vld [vmem:[#allocation2 + $0x438] sm:$0xff]  }
  0x6c   :  { %v343_v8 = vpack.c.bf16 %v231_v2, %v231_v2  ;;  %v342_v9 = vpack.c.bf16 %v230_v3, %v230_v3  ;;  %v3319_v2 = vld [vmem:[#allocation2 + $0x5e8] sm:$0xff]  }
  0x6d   :  { %2904 = vmatpush3.bf16.msra.mxu0 %v3226_v5  ;;  %v233_v5 = vcombine.high %v215_v63, %v229_v0  ;;  %v3320_v3 = vld [vmem:[#allocation2 + $0x528] sm:$0xff]  }
  0x6e   :  { %2926 = vmatpush3.bf16.msra.mxu1 %v3227_v6  ;;  %2933 = vmatprep.subr.bf16.mxu0 %v3234_v12  ;;  %v232_v6 = vcombine.low %v215_v63, %v229_v0  ;;  %v3316_v63 = vld [vmem:[#allocation2 + $0x530] sm:$0xff]  }
  0x6f   :  { %2955 = vmatprep.subr.bf16.mxu1 %v3235_v16  ;;  %v345_v11 = vpack.c.bf16 %v233_v5, %v233_v5  ;;  %v3280_v16 = vld [vmem:[#allocation2 + $0x468] sm:$0xff]   ;;  %v3317_v0 = vld [vmem:[#allocation2 + $0x5b0] sm:$0xff]   ;;  %v3322_v5 = vld [vmem:[#allocation2 + $0x560] sm:$0xff]  }
  0x70   :  { %2090 = vmatmul.mubr.bf16.vlgmr.msra.gmra.mxu0 %v338_v25  ;;  %v344_v12 = vpack.c.bf16 %v232_v6, %v232_v6  ;;  %v3289_v25 = vld [vmem:[#allocation2 + $0x4d8] sm:$0xff]   ;;  %v3323_v6 = vld [vmem:[#allocation2 + $0x5e0] sm:$0xff]  }
  0x71   :  { %2130 = vmatmul.mubr.bf16.vlgmr.msra.gmra.mxu1 %v340_v26  ;;  %2934 = vmatpush3.bf16.msra.mxu0 %v3236_v21  ;;  %v3285_v21 = vld [vmem:[#allocation2 + $0x4e0] sm:$0xff]   ;;  %v3290_v26 = vld [vmem:[#allocation2 + $0x418] sm:$0xff]  }
  0x72   :  { %2956 = vmatpush3.bf16.msra.mxu1 %v3237_v22  ;;  %2935 = vmatprep.subr.bf16.mxu0 %v3238_v27  ;;  %v3286_v22 = vld [vmem:[#allocation2 + $0x420] sm:$0xff]   ;;  %v3291_v27 = vld [vmem:[#allocation2 + $0x498] sm:$0xff]  }
  0x73   :  { %2957 = vmatprep.subr.bf16.mxu1 %v3239_v28  ;;  %2169 = vmatprep.mubr.bf16.mxu0 %v343_v8  ;;  %v3292_v28 = vld [vmem:[#allocation2 + $0x450] sm:$0xff]   ;;  %v3325_v8 = vld [vmem:[#allocation2 + $0x5a0] sm:$0xff]  }
  0x74   :  { %2209 = vmatprep.mubr.bf16.mxu1 %v345_v11  ;;  %v3328_v11 = vld [vmem:[#allocation2 + $0x518] sm:$0xff]  }
  0x75   :  { %2936 = vmatpush3.bf16.msra.mxu0 %v3240_v29  ;;  %v3293_v29 = vld [vmem:[#allocation2 + $0x4d0] sm:$0xff]  }
  0x76   :  { %2958 = vmatpush3.bf16.msra.mxu1 %v3241_v30  ;;  %2937 = vmatprep.subr.bf16.mxu0 %v3242_v31  ;;  %v3294_v30 = vld [vmem:[#allocation2 + $0x410] sm:$0xff]  }
  0x77   :  { %2959 = vmatprep.subr.bf16.mxu1 %v3243_v32  ;;  %v3295_v31 = vld [vmem:[#allocation2 + $0x490] sm:$0xff]   ;;  %v3296_v32 = vld [vmem:[#allocation2 + $0x448] sm:$0xff]  }
  0x79   :  { %2938 = vmatpush3.bf16.msra.mxu0 %v3244_v33  ;;  %v3297_v33 = vld [vmem:[#allocation2 + $0x4c8] sm:$0xff]  }
  0x7a   :  { %2960 = vmatpush3.bf16.msra.mxu1 %v3245_v34  ;;  %2939 = vmatprep.subr.bf16.mxu0 %v3246_v35  ;;  %v3298_v34 = vld [vmem:[#allocation2 + $0x408] sm:$0xff]  }
  0x7b   :  { %2961 = vmatprep.subr.bf16.mxu1 %v3247_v36  ;;  %v3299_v35 = vld [vmem:[#allocation2 + $0x488] sm:$0xff]   ;;  %v3300_v36 = vld [vmem:[#allocation2 + $0x440] sm:$0xff]  }
  0x7d   :  { %2940 = vmatpush3.bf16.msra.mxu0 %v3248_v38  ;;  %v3301_v38 = vld [vmem:[#allocation2 + $0x4c0] sm:$0xff]  }
  0x7e   :  { %2962 = vmatpush3.bf16.msra.mxu1 %v3249_v39  ;;  %2941 = vmatprep.subr.bf16.mxu0 %v3250_v40  ;;  %v3302_v39 = vld [vmem:[#allocation2 + $0x400] sm:$0xff]  }
  0x7f   :  { %2963 = vmatprep.subr.bf16.mxu1 %v3251_v41  ;;  %v3303_v40 = vld [vmem:[#allocation2 + $0x480] sm:$0xff]  }
  0x80   :  { %v3304_v41 = vld [vmem:[%s3616_s0 + $0x20] ss:$48 sps:$4 sm:$0xff]  }
  0x81   :  { %2942 = vmatpush3.bf16.msra.mxu0 %v3252_v42  ;;  %v3306_v42 = vld [vmem:[%s3616_s0 + $0x80] ss:$48 sps:$4 sm:$0xff]  }
  0x82   :  { %2964 = vmatpush3.bf16.msra.mxu1 %v3253_v43  ;;  %2943 = vmatprep.subr.bf16.mxu0 %v3254_v44  ;;  %v3308_v43 = vld [vmem:[%s3616_s0 + $0x24] ss:$48 sps:$4 sm:$0xff]  }
  0x83   :  { %2965 = vmatprep.subr.bf16.mxu1 %v3255_v45  ;;  %v3309_v44 = vld [vmem:[%s3616_s0 + $0x84] ss:$48 sps:$4 sm:$0xff]   ;;  %v244_v45 = vrot.slane %v3304_v41, %v3456_v37 }
  0x85   :  { %2944 = vmatpush3.bf16.msra.mxu0 %v3256_v46  ;;  %v258_v46 = vrot.slane %v3306_v42, %v3456_v37 }
  0x86   :  { %2966 = vmatpush3.bf16.msra.mxu1 %v3257_v47  ;;  %2945 = vmatprep.subr.bf16.mxu0 %v3258_v48  ;;  %v251_v47 = vrot.slane %v3308_v43, %v3456_v37  ;;  %v3310_v48 = vld [vmem:[#allocation2 + $0x578] sm:$0xff]  }
  0x87   :  { %2967 = vmatprep.subr.bf16.mxu1 %v3259_v49  ;;  %v265_v49 = vrot.slane %v3309_v44, %v3456_v37 }
  0x89   :  { %2946 = vmatpush3.bf16.msra.mxu0 %v3260_v50  ;;  %v3311_v50 = vld [vmem:[#allocation2 + $0x5f8] sm:$0xff]  }
  0x8a   :  { %2968 = vmatpush3.bf16.msra.mxu1 %v3261_v51  ;;  %2947 = vmatprep.subr.bf16.mxu0 %v3262_v52  ;;  %v267_v51 = vcombine.high %v244_v45, %v258_v46  ;;  %v266_v52 = vcombine.low %v244_v45, %v258_v46 }
  0x8b   :  { %2969 = vmatprep.subr.bf16.mxu1 %v3263_v53  ;;  %v3312_v53 = vld [vmem:[#allocation2 + $0x538] sm:$0xff]  }
  0x8c   :  { %v347_v57 = vpack.c.bf16 %v267_v51, %v267_v51  ;;  %v346_v58 = vpack.c.bf16 %v266_v52, %v266_v52 }
  0x8d   :  { %2948 = vmatpush3.bf16.msra.mxu0 %v3264_v54  ;;  %v269_v54 = vcombine.high %v251_v47, %v265_v49 }
  0x8e   :  { %2970 = vmatpush3.bf16.msra.mxu1 %v3265_v55  ;;  %2977 = vmatprep.subr.bf16.mxu0 %v3272_v62  ;;  %v268_v55 = vcombine.low %v251_v47, %v265_v49  ;;  %v3315_v62 = vld [vmem:[#allocation2 + $0x5f0] sm:$0xff]  }
  0x8f   :  { %2999 = vmatprep.subr.bf16.mxu1 %v3273_v1  ;;  %v349_v60 = vpack.c.bf16 %v269_v54, %v269_v54  ;;  %v3318_v1 = vld [vmem:[#allocation2 + $0x568] sm:$0xff]   ;;  %v3348_v54 = vld [vmem:[%s3619_s3 + $0x38] sm:$0xff]  }
  0x90   :  { %2170 = vmatmul.mubr.bf16.vlgmr.msra.gmra.mxu0 %v342_v9  ;;  %v348_v61 = vpack.c.bf16 %v268_v55, %v268_v55  ;;  %v3326_v9 = vld [vmem:[#allocation2 + $0x558] sm:$0xff]   ;;  %v3408_v55 = vmov 0.0  }
  0x91   :  { %2210 = vmatmul.mubr.bf16.vlgmr.msra.gmra.mxu1 %v344_v12  ;;  %2978 = vmatpush3.bf16.msra.mxu0 %v3274_v4  ;;  %v3321_v4 = vld [vmem:[#allocation2 + $0x5a8] sm:$0xff]   ;;  %v3329_v12 = vld [vmem:[#allocation2 + $0x598] sm:$0xff]  }
  0x92   :  { %3000 = vmatpush3.bf16.msra.mxu1 %v3275_v7  ;;  %2979 = vmatprep.subr.bf16.mxu0 %v3276_v10  ;;  %v3324_v7 = vld [vmem:[#allocation2 + $0x520] sm:$0xff]   ;;  %v3327_v10 = vld [vmem:[#allocation2 + $0x5d8] sm:$0xff]  }
  0x93   :  { %3001 = vmatprep.subr.bf16.mxu1 %v3277_v13  ;;  %2249 = vmatprep.mubr.bf16.mxu0 %v347_v57  ;;  %v3330_v13 = vld [vmem:[#allocation2 + $0x550] sm:$0xff]   ;;  %v3350_v57 = vld [vmem:[%s3619_s3 + $0x28] sm:$0xff]  }
  0x94   :  { %2289 = vmatprep.mubr.bf16.mxu1 %v349_v60 }
  0x95   :  { %2980 = vmatpush3.bf16.msra.mxu0 %v3278_v14  ;;  %v3331_v14 = vld [vmem:[#allocation2 + $0x5d0] sm:$0xff]  }
  0x96   :  { %3002 = vmatpush3.bf16.msra.mxu1 %v3279_v15  ;;  %2981 = vmatprep.subr.bf16.mxu0 %v3280_v16  ;;  %v3332_v15 = vld [vmem:[#allocation2 + $0x510] sm:$0xff]  }
  0x97   :  { %3003 = vmatprep.subr.bf16.mxu1 %v3281_v17  ;;  %v3333_v16 = vld [vmem:[#allocation2 + $0x590] sm:$0xff]   ;;  %v3334_v17 = vld [vmem:[#allocation2 + $0x548] sm:$0xff]  }
  0x99   :  { %2982 = vmatpush3.bf16.msra.mxu0 %v3282_v18  ;;  %v3335_v18 = vld [vmem:[#allocation2 + $0x5c8] sm:$0xff]  }
  0x9a   :  { %3004 = vmatpush3.bf16.msra.mxu1 %v3283_v19  ;;  %2983 = vmatprep.subr.bf16.mxu0 %v3284_v20  ;;  %v3336_v19 = vld [vmem:[#allocation2 + $0x508] sm:$0xff]  }
  0x9b   :  { %3005 = vmatprep.subr.bf16.mxu1 %v3285_v21  ;;  %v3337_v20 = vld [vmem:[#allocation2 + $0x588] sm:$0xff]   ;;  %v3338_v21 = vld [vmem:[#allocation2 + $0x540] sm:$0xff]  }
  0x9d   :  { %2984 = vmatpush3.bf16.msra.mxu0 %v3286_v22  ;;  %v3339_v22 = vld [vmem:[#allocation2 + $0x5c0] sm:$0xff]  }
  0x9e   :  { %3006 = vmatpush3.bf16.msra.mxu1 %v3287_v23  ;;  %2985 = vmatprep.subr.bf16.mxu0 %v3288_v24  ;;  %v3340_v23 = vld [vmem:[#allocation2 + $0x500] sm:$0xff]  }
  0x9f   :  { %3007 = vmatprep.subr.bf16.mxu1 %v3289_v25  ;;  %v3341_v24 = vld [vmem:[#allocation2 + $0x580] sm:$0xff]   ;;  %v3342_v25 = vld [vmem:[%s3616_s0 + $0x28] ss:$48 sps:$4 sm:$0xff]  }
  0xa1   :  { %2986 = vmatpush3.bf16.msra.mxu0 %v3290_v26  ;;  %v3344_v26 = vld [vmem:[%s3616_s0 + $0x88] ss:$48 sps:$4 sm:$0xff]  }
  0xa2   :  { %3008 = vmatpush3.bf16.msra.mxu1 %v3291_v27  ;;  %2987 = vmatprep.subr.bf16.mxu0 %v3292_v28  ;;  %v3346_v27 = vld [vmem:[%s3616_s0 + $0x2c] ss:$48 sps:$4 sm:$0xff]  }
  0xa3   :  { %3009 = vmatprep.subr.bf16.mxu1 %v3293_v29  ;;  %v3347_v28 = vld [vmem:[%s3616_s0 + $0x8c] ss:$48 sps:$4 sm:$0xff]   ;;  %v280_v29 = vrot.slane %v3342_v25, %v3456_v37 }
  0xa5   :  { %2988 = vmatpush3.bf16.msra.mxu0 %v3294_v30  ;;  %v294_v30 = vrot.slane %v3344_v26, %v3456_v37 }
  0xa6   :  { %3010 = vmatpush3.bf16.msra.mxu1 %v3295_v31  ;;  %2989 = vmatprep.subr.bf16.mxu0 %v3296_v32  ;;  %v287_v31 = vrot.slane %v3346_v27, %v3456_v37  ;;  %v301_v32 = vrot.slane %v3347_v28, %v3456_v37  ;;  %v2593_v37 = vld [vmem:[%s3618_s2] ss:$0 sm:$0xff] }
  0xa7   :  { %3011 = vmatprep.subr.bf16.mxu1 %v3297_v33  ;;  %v303_v33 = vcombine.high %v280_v29, %v294_v30 }
  0xa9   :  { %2990 = vmatpush3.bf16.msra.mxu0 %v3298_v34  ;;  %v305_v34 = vcombine.high %v287_v31, %v301_v32 }
  0xaa   :  { %3012 = vmatpush3.bf16.msra.mxu1 %v3299_v35  ;;  %2991 = vmatprep.subr.bf16.mxu0 %v3300_v36  ;;  %v302_v35 = vcombine.low %v280_v29, %v294_v30  ;;  %v304_v36 = vcombine.low %v287_v31, %v301_v32 }
  0xab   :  { %3013 = vmatprep.subr.bf16.mxu1 %v3301_v38  ;;  %v351_v38 = vpack.c.bf16 %v303_v33, %v303_v33 }
  0xac   :  { %v352_v41 = vpack.c.bf16 %v304_v36, %v304_v36 }
  0xad   :  { %2992 = vmatpush3.bf16.msra.mxu0 %v3302_v39  ;;  %v353_v39 = vpack.c.bf16 %v305_v34, %v305_v34 }
  0xae   :  { %3014 = vmatpush3.bf16.msra.mxu1 %v3303_v40  ;;  %3021 = vmatprep.subr.bf16.mxu0 %v3310_v48  ;;  %v350_v40 = vpack.c.bf16 %v302_v35, %v302_v35 }
  0xaf   :  { %3043 = vmatprep.subr.bf16.mxu1 %v3311_v50 }
  0xb0   :  { %2250 = vmatmul.mubr.bf16.vlgmr.msra.gmra.mxu0 %v346_v58  ;;  %v3351_v58 = vld [vmem:[%s3619_s3 + $0x20] sm:$0xff]  }
  0xb1   :  { %2290 = vmatmul.mubr.bf16.vlgmr.msra.gmra.mxu1 %v348_v61  ;;  %3022 = vmatpush3.bf16.msra.mxu0 %v3312_v53 }
  0xb2   :  { %3044 = vmatpush3.bf16.msra.mxu1 %v3313_v56  ;;  %3023 = vmatprep.subr.bf16.mxu0 %v3314_v59  ;;  %v3349_v56 = vld [vmem:[%s3619_s3 + $0x30] sm:$0xff]   ;;  %v3352_v59 = vld [vmem:[%s3619_s3 + $0x18] sm:$0xff]  }
  0xb3   :  { %3045 = vmatprep.subr.bf16.mxu1 %v3315_v62  ;;  %2329 = vmatprep.mubr.bf16.mxu0 %v351_v38 }
  0xb4   :  { %2369 = vmatprep.mubr.bf16.mxu1 %v353_v39 }
  0xb5   :  { %3024 = vmatpush3.bf16.msra.mxu0 %v3316_v63 }
  0xb6   :  { %3046 = vmatpush3.bf16.msra.mxu1 %v3317_v0  ;;  %3025 = vmatprep.subr.bf16.mxu0 %v3318_v1 }
  0xb7   :  { %3047 = vmatprep.subr.bf16.mxu1 %v3319_v2 }
  0xb9   :  { %3026 = vmatpush3.bf16.msra.mxu0 %v3320_v3 }
  0xba   :  { %3048 = vmatpush3.bf16.msra.mxu1 %v3321_v4  ;;  %3027 = vmatprep.subr.bf16.mxu0 %v3322_v5 }
  0xbb   :  { %3049 = vmatprep.subr.bf16.mxu1 %v3323_v6 }
  0xbd   :  { %3028 = vmatpush3.bf16.msra.mxu0 %v3324_v7 }
  0xbe   :  { %3050 = vmatpush3.bf16.msra.mxu1 %v3325_v8  ;;  %3029 = vmatprep.subr.bf16.mxu0 %v3326_v9  ;;  %v3353_v8 = vld [vmem:[%s3619_s3 + $0x10] sm:$0xff]   ;;  %v3354_v9 = vld [vmem:[%s3619_s3 + $0x8] sm:$0xff]  }
  0xbf   :  { %3051 = vmatprep.subr.bf16.mxu1 %v3327_v10  ;;  %v3355_v10 = vld [vmem:[%s3619_s3] sm:$0xff]  }
  0xc1   :  { %3030 = vmatpush3.bf16.msra.mxu0 %v3328_v11  ;;  %v3356_v11 = vld [vmem:[%s3621_s5 + $0x18] sm:$0xff]  }
  0xc2   :  { %3052 = vmatpush3.bf16.msra.mxu1 %v3329_v12  ;;  %3031 = vmatprep.subr.bf16.mxu0 %v3330_v13  ;;  %v3357_v12 = vld [vmem:[%s3621_s5 + $0x10] sm:$0xff]  }
  0xc3   :  { %3053 = vmatprep.subr.bf16.mxu1 %v3331_v14 }
  0xc5   :  { %3032 = vmatpush3.bf16.msra.mxu0 %v3332_v15 }
  0xc6   :  { %3054 = vmatpush3.bf16.msra.mxu1 %v3333_v16  ;;  %3033 = vmatprep.subr.bf16.mxu0 %v3334_v17 }
  0xc7   :  { %3055 = vmatprep.subr.bf16.mxu1 %v3335_v18 }
  0xc9   :  { %3034 = vmatpush3.bf16.msra.mxu0 %v3336_v19 }
  0xca   :  { %3056 = vmatpush3.bf16.msra.mxu1 %v3337_v20  ;;  %3035 = vmatprep.subr.bf16.mxu0 %v3338_v21 }
  0xcb   :  { %3057 = vmatprep.subr.bf16.mxu1 %v3339_v22 }
  0xcd   :  { %3036 = vmatpush3.bf16.msra.mxu0 %v3340_v23 }
  0xce   :  { %3058 = vmatpush3.bf16.msra.mxu1 %v3341_v24  ;;  %3079 = vmatprep.subr.bf16.mxu0 %v3408_v55 }
  0xcf   :  { %3099 = vmatprep.subr.bf16.mxu1 %v3408_v55 }
  0xd0   :  { %2330 = vmatmul.mubr.bf16.vlgmr.msra.gmra.mxu0 %v350_v40 }
  0xd1   :  { %2370 = vmatmul.mubr.bf16.vlgmr.msra.gmra.mxu1 %v352_v41  ;;  %3080 = vmatpush3.bf16.msra.mxu0 %v3348_v54 }
  0xd2   :  { %3081 = vmatprep.subr.bf16.mxu0 %v3408_v55  ;;  %3095 = vmatprep.mubr.msk.bf16.mxu0 %vm3409_vm0, %v3408_v55 }
  0xd3   :  { %3107 = vmatprep.mubr.msk.bf16.mxu1 %vm3409_vm0, %v3408_v55  ;;  %3100 = vmatpush3.bf16.msra.mxu1 %v3356_v11 }
  0xd4   :  { %3101 = vmatprep.subr.bf16.mxu1 %v3408_v55 }
  0xd5   :  { %3082 = vmatpush3.bf16.msra.mxu0 %v3349_v56 }
  0xd6   :  { %3083 = vmatprep.subr.bf16.mxu0 %v3408_v55 }
  0xd7   :  { %3102 = vmatpush3.bf16.msra.mxu1 %v3357_v12 }
  0xd8   :  { %3103 = vmatprep.subr.bf16.mxu1 %v3408_v55 }
  0xd9   :  { %3084 = vmatpush3.bf16.msra.mxu0 %v3350_v57 }
  0xda   :  { %3085 = vmatprep.subr.bf16.mxu0 %v3408_v55 }
  0xdd   :  { %3086 = vmatpush3.bf16.msra.mxu0 %v3351_v58 }
  0xde   :  { %3087 = vmatprep.subr.bf16.mxu0 %v3408_v55 }
  0xe1   :  { %3088 = vmatpush3.bf16.msra.mxu0 %v3352_v59 }
  0xe2   :  { %3089 = vmatprep.subr.bf16.mxu0 %v3408_v55 }
  0xe5   :  { %3090 = vmatpush3.bf16.msra.mxu0 %v3353_v8 }
  0xe6   :  { %3091 = vmatprep.subr.bf16.mxu0 %v3408_v55 }
  0xe9   :  { %3092 = vmatpush3.bf16.msra.mxu0 %v3354_v9 }
  0xea   :  { %3093 = vmatprep.subr.bf16.mxu0 %v3408_v55 }
  0xed   :  { %3094 = vmatpush3.bf16.msra.mxu0 %v3355_v10 }
  0xf0   :  { %v2817_v42 = vpop.f32.mrf.mxu0 }
  0xf1   :  { %v2839_v43 = vpop.f32.mrf.mxu1 }
  0xf2   :  { %v2818_v44 = vpop.f32.mrf.mxu0 }
  0xf3   :  { %v2819_v45 = vadd.f32 %v2818_v44, %v2817_v42  ;;  %v2840_v46 = vpop.f32.mrf.mxu1 }
  0xf4   :  { %v2841_v47 = vadd.f32 %v2840_v46, %v2839_v43  ;;  %v2820_v48 = vpop.f32.mrf.mxu0 }
  0xf5   :  { %v1932_v49 = vadd.f32 %v2819_v45, %v2593_v37  ;;  %v2842_v50 = vpop.f32.mrf.mxu1 }
  0xf6   :  { %v2821_v51 = vpop.f32.mrf.mxu0 }
  0xf7   :  { %v1972_v52 = vadd.f32 %v2841_v47, %v1932_v49  ;;  %v2843_v53 = vpop.f32.mrf.mxu1 }
 0x110   :  { %v2861_v60 = vpop.f32.mrf.mxu0 }
 0x111   :  { %v2883_v61 = vpop.f32.mrf.mxu1 }
 0x112   :  { %v2862_v62 = vpop.f32.mrf.mxu0 }
 0x113   :  { %v2863_v63 = vadd.f32 %v2862_v62, %v2861_v60  ;;  %v2884_v0 = vpop.f32.mrf.mxu1 }
 0x114   :  { %v2885_v1 = vadd.f32 %v2884_v0, %v2883_v61  ;;  %v2864_v2 = vpop.f32.mrf.mxu0  ;;  %v3358_v0 = vld [vmem:[%s3621_s5 + $0x8] sm:$0xff]  }
 0x115   :  { %v2012_v3 = vadd.f32 %v2863_v63, %v1972_v52  ;;  %v2886_v4 = vpop.f32.mrf.mxu1  ;;  %3104 = vmatpush3.bf16.msra.mxu1 %v3358_v0  ;;  %v2786_v2 = vld [vmem:[%s3620_s4] ss:$0 sm:$0xff] }
 0x116   :  { %v2865_v5 = vpop.f32.mrf.mxu0  ;;  %3105 = vmatprep.subr.bf16.mxu1 %v3408_v55  ;;  %v2795_v55 = vld [vmem:[%s3622_s6] ss:$0 sm:$0xff] }
 0x117   :  { %v2052_v6 = vadd.f32 %v2885_v1, %v2012_v3  ;;  %v2887_v7 = vpop.f32.mrf.mxu1  ;;  %v3359_v1 = vld [vmem:[%s3621_s5] sm:$0xff]  }
 0x119   :  { %3106 = vmatpush3.bf16.msra.mxu1 %v3359_v1 }
 0x130   :  { %v2905_v13 = vpop.f32.mrf.mxu0 }
 0x131   :  { %v2927_v14 = vpop.f32.mrf.mxu1 }
 0x132   :  { %v2906_v15 = vpop.f32.mrf.mxu0 }
 0x133   :  { %v2928_v16 = vpop.f32.mrf.mxu1  ;;  %v2907_v17 = vadd.f32 %v2906_v15, %v2905_v13 }
 0x134   :  { %v2929_v18 = vadd.f32 %v2928_v16, %v2927_v14  ;;  %v2908_v19 = vpop.f32.mrf.mxu0 }
 0x135   :  { %v2930_v20 = vpop.f32.mrf.mxu1  ;;  %v2092_v21 = vadd.f32 %v2907_v17, %v2052_v6 }
 0x136   :  { %v2909_v22 = vpop.f32.mrf.mxu0 }
 0x137   :  { %v2931_v23 = vpop.f32.mrf.mxu1  ;;  %v2132_v24 = vadd.f32 %v2929_v18, %v2092_v21 }
 0x150   :  { %v2949_v25 = vpop.f32.mrf.mxu0 }
 0x151   :  { %v2971_v26 = vpop.f32.mrf.mxu1 }
 0x152   :  { %v2950_v27 = vpop.f32.mrf.mxu0 }
 0x153   :  { %v2951_v28 = vadd.f32 %v2950_v27, %v2949_v25  ;;  %v2972_v29 = vpop.f32.mrf.mxu1 }
 0x154   :  { %v2973_v30 = vadd.f32 %v2972_v29, %v2971_v26  ;;  %v2952_v31 = vpop.f32.mrf.mxu0 }
 0x155   :  { %v2172_v32 = vadd.f32 %v2951_v28, %v2132_v24  ;;  %v2974_v33 = vpop.f32.mrf.mxu1 }
 0x156   :  { %v2953_v34 = vpop.f32.mrf.mxu0 }
 0x157   :  { %v2212_v35 = vadd.f32 %v2973_v30, %v2172_v32  ;;  %v2975_v36 = vpop.f32.mrf.mxu1 }
 0x170   :  { %v2993_v38 = vpop.f32.mrf.mxu0 }
 0x171   :  { %v3015_v39 = vpop.f32.mrf.mxu1 }
 0x172   :  { %v2994_v40 = vpop.f32.mrf.mxu0 }
 0x173   :  { %v3016_v41 = vpop.f32.mrf.mxu1  ;;  %v2995_v45 = vadd.f32 %v2994_v40, %v2993_v38 }
 0x174   :  { %v2996_v42 = vpop.f32.mrf.mxu0  ;;  %v3017_v47 = vadd.f32 %v3016_v41, %v3015_v39 }
 0x175   :  { %v3018_v43 = vpop.f32.mrf.mxu1  ;;  %v2252_v46 = vadd.f32 %v2995_v45, %v2212_v35 }
 0x176   :  { %v2997_v37 = vpop.f32.mrf.mxu0 }
 0x177   :  { %v3019_v44 = vpop.f32.mrf.mxu1  ;;  %v2292_v52 = vadd.f32 %v3017_v47, %v2252_v46 }
 0x190   :  { %v3037_v48 = vpop.f32.mrf.mxu0 }
 0x191   :  { %v3059_v49 = vpop.f32.mrf.mxu1 }
 0x192   :  { %v3038_v50 = vpop.f32.mrf.mxu0 }
 0x193   :  { %v3060_v51 = vpop.f32.mrf.mxu1  ;;  %v3039_v53 = vadd.f32 %v3038_v50, %v3037_v48 }
 0x194   :  { %v3040_v54 = vpop.f32.mrf.mxu0  ;;  %v3061_v58 = vadd.f32 %v3060_v51, %v3059_v49 }
 0x195   :  { %v3062_v56 = vpop.f32.mrf.mxu1  ;;  %v2332_v57 = vadd.f32 %v3039_v53, %v2292_v52 }
 0x196   :  { %v3041_v59 = vpop.f32.mrf.mxu0 }
 0x197   :  { %v3063_v60 = vpop.f32.mrf.mxu1  ;;  %v2372_v61 = vadd.f32 %v3061_v58, %v2332_v57 }
 0x199   :  { %v2377_v62 = vmax.f32 %v2372_v61, 0.0 }
 0x19b   :  { %v2378_v63 = vpack.c.bf16 %v2377_v62, %v2377_v62 }
 0x19d   :  { %3096 = vmatmul.mubr.bf16.vlgmr.msra.gmra.mxu0 %v2378_v63 }
 0x25d   :  { %v2484_v3 = vpop.f32.mrf.mxu0 }
 0x25e   :  { %v2485_v4 = vadd.f32 %v2786_v2, %v2484_v3 }
 0x25f   :  { %v3097_v5 = vpop.f32.mrf.mxu0 }
 0x260   :  { %v2490_v6 = vmax.f32 %v2485_v4, 0.0 }
 0x261   :  { %v2487_v7 = vpop.f32.mrf.mxu0 }
 0x262   :  { %v2491_v8 = vpack.c.bf16 %v2490_v6, %v2490_v6 }
 0x263   :  { %v3098_v9 = vpop.f32.mrf.mxu0 }
 0x264   :  { %3108 = vmatmul.mubr.msk.bf16.vlgmr.msra.gmra.mxu1 %vm2531_vm1, %v2491_v8 }
 0x324   :  { %v2569_v10 = vpop.f32.mrf.mxu1 }
 0x325   :  { %v2570_v11 = vadd.f32 %v2795_v55, %v2569_v10 }
 0x326   :  { %v3109_v12 = vpop.f32.mrf.mxu1 }
 0x327   :  { %2575 = vst [vmem:[#allocation5] sm:$0xff] %v2570_v11 }
 0x328   :  { %v2572_v13 = vpop.f32.mrf.mxu1 }
 0x32a   :  { %v3110_v14 = vpop.f32.mrf.mxu1 }
 0x32b   :  { %2580 = vsyncadd [#allocation4], 96  ;;  %s3410_s4 = smov [#allocation5]  }
 0x32c   :  { %s2581_s5 = sshll.u32 %s3410_s4, 4  ;;  %s2582_s5 = int_to_ptr.vmem [resolvable:$true] %s2581_s5 }
 0x32d   :  { %s3380_s9 = scalar_lea.vmem %s2582_s5, 32  ;;  %s3384_s2 = scalar_lea.vmem %s2582_s5, 128 }
 0x32e   :  { %p3381_p5 = scmp.ne.s32.totalorder %s2582_s5, %s3380_s9  ;;  %p3385_p6 = scmp.lt.s32.totalorder %s2582_s5, %s2582_s5 }
 0x32f   :  { %p3386_p7 = scmp.lt.s32.totalorder %s3384_s2, %s3380_s9 }
 0x331   :  { %p3387_p8 = por %p3386_p7, %p3385_p6 }
 0x333   :  { %p3388_p9 = pnand %p3387_p8, %p3381_p5 }
 0x335   :  { %3391 = shalt.err (!%p3388_p9)
}
 0x336   :  { %s3411_s10 = smov 32   ;;  %s3412_s6 = smov 2  }
 0x337   :  { %2587 = dma.vmem_to_hbm [thread:$0]  %s2582_s5, 32, %s3623_s7, [#allocation4], %s3411_s10, %s3411_s10, %s3412_s6  }
 0x338   :  { %3402 = dma.done.wait [#allocation4], 128  }
 0x339   :  { %3403 = vsyncadd [#allocation4], 4294967168 }
 0x33a   :  { %2591 = vsyncpa [#allocation3], 1 }
 0x33b   :  { %2592 = vsyncpa [#allocation4], 1 }

</bundles_post_ra>
